<compile_context>
chip_gen: v5e
topology: v5e:2x2
jax: 0.10.0
libtpu: 0.0.40
codegen_flags: <defaults>
</compile_context>

<pallas_src>
import jax
import jax.numpy as jnp
from jax import lax
from jax.experimental import pallas as pl
from jax.experimental.pallas import tpu as pltpu

EPS = 1e-8      # PixelNorm epsilon (module default)
LANE = 128      # TPU lane width


def _pixelnorm_kernel(x_ref, o_ref):
    """One (bn, C, s_rows, 128) block: normalize each spatial column by channel RMS.

    C is a leading block axis (not mapped to sublanes), so jnp.sum(axis=1) is a
    chain of vreg adds on the VPU; rsqrt goes to the EUP slot and its result is
    reused directly (broadcast over the leading C axis is free).
    """
    inv_c = jnp.float32(1.0 / x_ref.shape[1])
    # Pass 1: sum of squares over channels, accumulated in f32.
    xsq = jnp.square(x_ref[...].astype(jnp.float32))
    ms = jnp.sum(xsq, axis=1, keepdims=True) * inv_c          # (bn, 1, s_rows, 128)
    scale = lax.rsqrt(ms + EPS)
    # Pass 2: re-read x from VMEM (cheap vld slots) instead of keeping the whole
    # f32 block live across the reduction -> no vreg spills for large tiles.
    o_ref[...] = (x_ref[...].astype(jnp.float32) * scale).astype(o_ref.dtype)


def pixel_norm(x):
    """PixelNorm forward.  x: (N, C, *spatial), float dtype."""
    orig_shape = x.shape
    N, C = int(x.shape[0]), int(x.shape[1])
    S = 1
    for d in x.shape[2:]:
        S *= int(d)
    S = max(S, 1)

    itemsize = int(jnp.dtype(x.dtype).itemsize)

    # Pad flattened spatial dim to a lane multiple so every tile is lane-dense.
    # Padded columns are zero -> ms = 0 -> ms + EPS > 0 -> finite output, and
    # they are sliced off below.  (Do NOT remove EPS: it also keeps the padded
    # / partial-block columns finite.)
    S_pad = pl.cdiv(S, LANE) * LANE
    rows = S_pad // LANE

    x3 = x.reshape(N, C, S)
    if S_pad != S:
        x3 = jnp.pad(x3, ((0, 0), (0, 0), (0, S_pad - S)))
    x4 = x3.reshape(N, C, rows, LANE)

    # --- block sizing: by total bytes of the *actual* dtype (~2 MiB/block) ----
    target_block_bytes = 2 * 1024 * 1024
    bytes_per_row = C * LANE * itemsize               # one batch elem, one 128-col row
    max_rows = max(1, target_block_bytes // bytes_per_row)

    if rows <= max_rows:
        s_rows = rows                                  # full extent: always legal
        bytes_per_batch = C * rows * LANE * itemsize
        bn = int(min(N, max(1, target_block_bytes // bytes_per_batch)))
    else:
        s_rows = max(8, (max_rows // 8) * 8)           # sublane-aligned tile
        bn = 1

    # Keep >= 2 grid steps when possible (v7x has 2 TensorCores per chip).
    if pl.cdiv(N, bn) == 1 and pl.cdiv(rows, s_rows) == 1:
        if N >= 2:
            bn = (N + 1) // 2
        elif rows >= 16:
            s_rows = max(8, (-(-((rows + 1) // 2) // 8)) * 8)

    grid = (pl.cdiv(N, bn), pl.cdiv(rows, s_rows))

    # VMEM budget: in+out double-buffered blocks plus f32 intermediates,
    # capped below v7x's 64 MiB per-TensorCore VMEM (leave compiler headroom).
    block_bytes = bn * C * s_rows * LANE * itemsize
    block_bytes_f32 = bn * C * s_rows * LANE * 4
    vmem_limit = int(min(max(4 * block_bytes + 4 * block_bytes_f32,
                             16 * 1024 * 1024),
                         40 * 1024 * 1024))

    nbytes = x4.size * itemsize
    cost = pl.CostEstimate(
        flops=3 * N * C * S,          # square, reduce-add, scale (rough)
        transcendentals=N * S,        # one rsqrt per spatial column
        bytes_accessed=2 * nbytes,    # one read + one write of x
    )

    out = pl.pallas_call(
        _pixelnorm_kernel,
        grid=grid,
        in_specs=[pl.BlockSpec((bn, C, s_rows, LANE), lambda n, r: (n, 0, r, 0))],
        out_specs=pl.BlockSpec((bn, C, s_rows, LANE), lambda n, r: (n, 0, r, 0)),
        out_shape=jax.ShapeDtypeStruct((N, C, rows, LANE), x.dtype),
        compiler_params=pltpu.CompilerParams(
            dimension_semantics=("parallel", "parallel"),
            vmem_limit_bytes=vmem_limit,
        ),
        cost_estimate=cost,
    )(x4)

    out = out.reshape(N, C, S_pad)
    if S_pad != S:
        out = out[:, :, :S]
    return out.reshape(orig_shape)


def pixel_norm_reference(x):
    """Pure-JAX reference mirroring the PyTorch module."""
    xf = x.astype(jnp.float32)
    ms = jnp.mean(jnp.square(xf), axis=1, keepdims=True)
    return (xf / jnp.sqrt(ms + EPS)).astype(x.dtype)


if __name__ == "__main__":
    key = jax.random.PRNGKey(0)
    k1, k2, k3, k4 = jax.random.split(key, 4)

    # NCHW feature map, NCDHW case, a non-128-multiple spatial case, and bf16.
    x_2d = jax.random.normal(k1, (2, 4, 16, 16), dtype=jnp.float32)
    x_3d = jax.random.normal(k2, (2, 8, 4, 8, 8), dtype=jnp.float32)
    x_odd = jax.random.normal(k3, (2, 4, 5, 7), dtype=jnp.float32)
    x_bf = jax.random.normal(k4, (2, 4, 16, 16), dtype=jnp.float32).astype(jnp.bfloat16)

    ok = True
    for x, atol in ((x_2d, 1e-5), (x_3d, 1e-5), (x_odd, 1e-5), (x_bf, 1e-2)):
        out = jax.block_until_ready(pixel_norm(x))
        ref = pixel_norm_reference(x)
        ok &= out.shape == x.shape
        ok &= bool(jnp.allclose(out.astype(jnp.float32), ref.astype(jnp.float32),
                                atol=atol, rtol=atol))

    assert ok
    print("KERNEL_OK")
</pallas_src>

<mosaic_0001>
module attributes {stable_mosaic.version = 11 : i64} {
  func.func @_pixelnorm_kernel(%arg0: i32, %arg1: i32, %arg2: memref<1x4x2x128xf32, #tpu.memory_space<vmem>>, %arg3: memref<1x4x2x128xf32, #tpu.memory_space<vmem>>) attributes {dimension_semantics = [#tpu.dimension_semantics<parallel>, #tpu.dimension_semantics<parallel>], iteration_bounds = array<i64: 2, 1>, scalar_prefetch = 0 : i64, scratch_operands = 0 : i64, tpu.core_type = #tpu.core_type<tc>, window_params = [{transform_indices = @transform_0, window_bounds = array<i64: 1, 4, 2, 128>}, {transform_indices = @transform_1, window_bounds = array<i64: 1, 4, 2, 128>}]} {
    %c0 = arith.constant 0 : index
    %c0_0 = arith.constant 0 : index
    %c0_1 = arith.constant 0 : index
    %c0_2 = arith.constant 0 : index
    %0 = vector.load %arg2[%c0, %c0_0, %c0_1, %c0_2] : memref<1x4x2x128xf32, #tpu.memory_space<vmem>>, vector<1x4x2x128xf32>
    %1 = arith.mulf %0, %0 : vector<1x4x2x128xf32>
    %cst = arith.constant dense<0.000000e+00> : vector<1x2x128xf32>
    %2 = vector.multi_reduction <add>, %1, %cst [1] : vector<1x4x2x128xf32> to vector<1x2x128xf32>
    %3 = vector.shape_cast %2 : vector<1x2x128xf32> to vector<1x1x2x128xf32>
    %cst_3 = arith.constant 2.500000e-01 : f32
    %4 = vector.broadcast %cst_3 : f32 to vector<1x1x2x128xf32>
    %5 = arith.mulf %3, %4 : vector<1x1x2x128xf32>
    %cst_4 = arith.constant 9.99999993E-9 : f32
    %6 = vector.broadcast %cst_4 : f32 to vector<1x1x2x128xf32>
    %7 = arith.addf %5, %6 : vector<1x1x2x128xf32>
    %8 = math.rsqrt %7 : vector<1x1x2x128xf32>
    %c0_5 = arith.constant 0 : index
    %c0_6 = arith.constant 0 : index
    %c0_7 = arith.constant 0 : index
    %c0_8 = arith.constant 0 : index
    %9 = vector.load %arg2[%c0_5, %c0_6, %c0_7, %c0_8] : memref<1x4x2x128xf32, #tpu.memory_space<vmem>>, vector<1x4x2x128xf32>
    %10 = vector.broadcast %8 : vector<1x1x2x128xf32> to vector<1x4x2x128xf32>
    %11 = arith.mulf %9, %10 : vector<1x4x2x128xf32>
    %c0_9 = arith.constant 0 : index
    %c0_10 = arith.constant 0 : index
    %c0_11 = arith.constant 0 : index
    %c0_12 = arith.constant 0 : index
    %12 = vector.load %arg3[%c0_9, %c0_10, %c0_11, %c0_12] : memref<1x4x2x128xf32, #tpu.memory_space<vmem>>, vector<1x4x2x128xf32>
    tpu.vector_store %arg3[%c0_9, %c0_10, %c0_11, %c0_12], %11 {strides = array<i32>} : memref<1x4x2x128xf32, #tpu.memory_space<vmem>>, vector<1x4x2x128xf32>,
    return
  }
  func.func @transform_0(%arg0: i32, %arg1: i32) -> (i32, i32, i32, i32) {
    %c0_i32 = arith.constant 0 : i32
    %c0_i32_0 = arith.constant 0 : i32
    %c0_i32_1 = arith.constant 0 : i32
    return %arg0, %c0_i32, %arg1, %c0_i32_0 : i32, i32, i32, i32
  }
  func.func @transform_1(%arg0: i32, %arg1: i32) -> (i32, i32, i32, i32) {
    %c0_i32 = arith.constant 0 : i32
    %c0_i32_0 = arith.constant 0 : i32
    %c0_i32_1 = arith.constant 0 : i32
    return %arg0, %c0_i32, %arg1, %c0_i32_0 : i32, i32, i32, i32
  }
}

</mosaic_0001>

<bundles_post_ra>
// kernel: tpu_custom_call.1
= control target key start
LH: loop header
LB: loop body
LE: loop exit
PB: predicated region body
PF: predicated region fallthrough
CT: control target
= control target key end

     0   :  { %6 = vsyncpa [#allocation3], 0  ;;  %s629_s0 = inlined_call_operand.hbm [shape: f32[2,4,2,128], index: 0, kind: input, shape index: {}]   ;;  %s630_s1 = inlined_call_operand.hbm [shape: f32[2,4,2,128], index: 1, kind: output, shape index: {}]  }
   0x1   :  { %8 = vsyncpa [#allocation3 + $0x1], 0 }
   0x2   :  { %9 = vsyncpa [#allocation4], 0 }
   0x3   :  { %11 = vsyncpa [#allocation4 + $0x1], 0  ;;  %s505_s6 = smov 0   ;;  %s507_s7 = smov 0  }
   0x4   :  { %s509_s8 = smov 0   ;;  %s511_s9 = smov 0  }
   0x5   :  { %s513_s10 = smov 0   ;;  %s515_s11 = smov 0  }
   0x6 LB: > { %s292_s12 = sadd.s32 4294967295, %s489_s11   ;;  %s293_s13 = sadd.s32 4294967294, %s489_s11   ;;  %s489_s11 = sphi %s515_s11, %s17_s11   ;;  %s485_s10 = sphi %s513_s10, %s639_s10   ;;  %s481_s9 = sphi %s511_s9, %s638_s9   ;;  %s477_s8 = sphi %s509_s8, %s637_s8   ;;  %s473_s7 = sphi %s507_s7, %s636_s7   ;;  %s469_s6 = sphi %s505_s6, %s635_s6  }
   0x7   : > { %s29_s14 = sadd.s32 1, %s485_s10  ;;  %s38_s15 = sadd.s32 1, %s477_s8 }
   0x8   : > { %p31_p0 = scmp.ge.s32.totalorder %s29_s14, 2  ;;  %p45_p1 = scmp.ne.s32.totalorder %s477_s8, %s473_s7 }
   0x9   : > { %p46_p2 = scmp.eq.s32.totalorder %s489_s11, 0  ;;  %p51_p3 = scmp.ne.s32.totalorder %s473_s7, %s469_s6 }
   0xa   : > { %s641_s14 = smov (%p31_p0, %s29_s14), 0  ;;  %p52_p5 = scmp.eq.s32.totalorder %s292_s12, 0 }
   0xb   : > { %p546_p4 = por %p46_p2, %p45_p1  ;;  %s33_s17 = ssub.s32 %s485_s10, %s641_s14 }
   0xc   : > { %p77_p6 = scmp.eq.s32.totalorder %s292_s12, 1  ;;  %p36_p7 = scmp.eq.s32.totalorder %s33_s17, 0 }
   0xd   : > { %p552_p8 = por %p52_p5, %p51_p3  ;;  %p83_p10 = scmp.eq.s32.totalorder %s293_s13, 1 }
   0xe   : > { %p556_p9 = por %p77_p6, %p45_p1  ;;  %p295_p12 = scmp.ge.s32.totalorder %s489_s11, 2 }
   0xf   : > { %s561_s20 = scalar_select %p36_p7, %s477_s8, %s38_s15  }
  0x10   : > { %p563_p11 = por %p83_p10, %p51_p3  ;;  %p321_p13 = scmp.lt.s32.totalorder %s489_s11, 2 }
  0x11   : > { %s103_s22 = sand.u32 1, %s477_s8   ;;  %s307_s24 = sshll.u32 %s485_s10, 3 }
  0x12   : > { %s296_s23 = sshll.u32 %s103_s22, 3  ;;  %s113_s27 = scalar_lea.hbm %s629_s0, %s307_s24 }
  0x13   : > { %s107_s28 = scalar_lea.vmem [#allocation2], %s296_s23  ;;  %s114_s30 = sshll.u32 %s113_s27, 4  ;;  %s115_s30 = int_to_ptr.hbm [resolvable:$true] %s114_s30 }
  0x14   : > { %s116_s29 = sshll.u32 %s107_s28, 4  ;;  %p314_p0 = pnand %p321_p13, %p546_p4  ;;  %s117_s29 = int_to_ptr.vmem [resolvable:$true] %s116_s29 }
  0x15   : > { %p299_p1 = scmp.ge.s32.totalorder %s489_s11, 1  ;;  %s104_s2 = scalar_lea.sflag [#allocation3], %s103_s22 }
  0x16   : > { %s491_s3 = smov 32   ;;  %s492_s4 = smov 2  }
  0x17   : > { %316 = dma.hbm_to_vmem [thread:$0]  (!%p314_p0), %s115_s30, 128, %s117_s29, %s104_s2, %s491_s3, %s491_s3, %s492_s4  }
  0x18   : > { %p124_p2 = scmp.lt.s32.totalorder %s489_s11, 3 }
  0x1a   : > { %p125_p3 = pnand %p299_p1, %p124_p2 }
  0x1b   : > { %s579_s5 = sand.u32 (!%p125_p3), 1, %s473_s7  }
  0x1c   : > { %128 = sbr.rel (%p125_p3) target bundleno = 75 (0x4b), region = 24  ;;  %s300_s12 = sshll.u32 (!%p125_p3), %s579_s5, 3 }
  0x1d   : > { %s131_s13 = scalar_lea.sflag (!%p125_p3), [#allocation3], %s579_s5  ;;  %s134_s15 = scalar_lea.vmem (!%p125_p3), [#allocation2], %s300_s12 }
  0x21   : > { %460 = dma.done.wait (%p552_p8), %s131_s13, 128  }
  0x22   : > { %462 = vsyncadd (%p552_p8), %s131_s13, 4294967168  ;;  %vm162_vm0 = vcmask 1041408   ;;  %v154_v0 = vld [vmem:[%s134_s15] sm:$0x3]  ;;  %v155_v1 = vld [vmem:[%s134_s15 + $0x2] sm:$0x3] }
  0x23   : > { %v156_v2 = vld [vmem:[%s134_s15 + $0x4] sm:$0x3]  ;;  %v157_v3 = vld [vmem:[%s134_s15 + $0x6] sm:$0x3]  ;;  %v158_v4 = vmul.f32 %v154_v0, %v154_v0  ;;  %v159_v5 = vmul.f32 %v155_v1, %v155_v1  ;;  %s308_s16 = sshll.u32 %s481_s9, 3  ;;  %s153_s23 = scalar_lea.vmem [#allocation5], %s300_s12 }
  0x24   : > { %v160_v6 = vmul.f32 %v156_v2, %v156_v2  ;;  %v161_v7 = vmul.f32 %v157_v3, %v157_v3  ;;  %s203_s22 = scalar_lea.hbm %s630_s1, %s308_s16  ;;  %s204_s24 = sshll.u32 %s153_s23, 4  ;;  %s205_s24 = int_to_ptr.vmem [resolvable:$true] %s204_s24 }
  0x25   : > { %v163_v8 = vsel %vm162_vm0, %v158_v4, 0.0  ;;  %v164_v9 = vsel %vm162_vm0, %v159_v5, 0.0  ;;  %s206_s25 = sshll.u32 %s203_s22, 4  ;;  %s191_s9 = scalar_lea.sflag [#allocation4], %s579_s5  ;;  %s207_s25 = int_to_ptr.hbm [resolvable:$true] %s206_s25 }
  0x26   : > { %v166_v10 = vsel %vm162_vm0, %v160_v6, 0.0  ;;  %v165_v11 = vadd.f32 %v164_v9, %v163_v8  ;;  %v168_v12 = vsel %vm162_vm0, %v161_v7, 0.0  ;;  %s421_s26 = sshra.s32 %s207_s25, 4  ;;  %s427_s30 = scalar_lea.hbm %s630_s1, 16  ;;  %s422_s26 = int_to_ptr.hbm [resolvable:$true] %s421_s26 }
  0x27   : > { %s423_s27 = scalar_lea.hbm %s422_s26, 8  ;;  %p428_p7 = scmp.lt.s32.totalorder %s422_s26, %s630_s1 }
  0x28   : > { %v167_v13 = vadd.f32 %v166_v10, %v165_v11  ;;  %p424_p4 = scmp.ne.s32.totalorder %s422_s26, %s423_s27  ;;  %p429_p8 = scmp.lt.s32.totalorder %s427_s30, %s423_s27 }
  0x2a   : > { %v169_v14 = vadd.f32 %v168_v12, %v167_v13  ;;  %p425_p5 = pnand %p424_p4, %p556_p9  ;;  %p430_p10 = por %p429_p8, %p428_p7 }
  0x2c   : > { %v170_v15 = vmul.f32 0.25, %v169_v14  ;;  %p426_p6 = pneg %p425_p5 }
  0x2e   : > { %v171_v16 = vadd.f32 1e-08, %v170_v15  ;;  %p431_p13 = pnand %p430_p10, %p426_p6 }
  0x30   : > { %375 = vrsqrt.f32 %v171_v16  ;;  %vm178_vm1 = vweird.f32 %v171_v16 }
  0x36   : > { %v376_v17 = vpop.eup %375 }
  0x37   : > { %v173_v18 = vmul.f32 %v376_v17, %v171_v16  ;;  %vm179_vm2 = vweird.f32 %v376_v17 }
  0x38   : > { %vm180_vm3 = vmor %vm178_vm1, %vm179_vm2 }
  0x39   : > { %v174_v19 = vmul.f32 %v376_v17, %v173_v18 }
  0x3b   : > { %v175_v20 = vmul.f32 0.5, %v174_v19 }
  0x3d   : > { %v176_v21 = vsub.f32 1.5, %v175_v20 }
  0x3f   : > { %v177_v22 = vmul.f32 %v376_v17, %v176_v21 }
  0x41   : > { %v181_v23 = vsel %vm180_vm3, %v376_v17, %v177_v22 }
  0x42   : > { %v182_v24 = vmul.f32 %v181_v23, %v154_v0  ;;  %v183_v25 = vmul.f32 %v181_v23, %v155_v1  ;;  %v184_v26 = vmul.f32 %v181_v23, %v156_v2  ;;  %v185_v27 = vmul.f32 %v181_v23, %v157_v3 }
  0x44   : > { %186 = vst [vmem:[%s153_s23] sm:$0x3] %v182_v24 }
  0x45   : > { %187 = vst [vmem:[%s153_s23 + $0x2] sm:$0x3] %v183_v25 }
  0x46   : > { %188 = vst [vmem:[%s153_s23 + $0x4] sm:$0x3] %v184_v26 }
  0x47   : > { %189 = vst [vmem:[%s153_s23 + $0x6] sm:$0x3] %v185_v27 }
  0x48   : > { %434 = shalt.err (!%p431_p13)
}
  0x49   : > { %s493_s4 = smov 32   ;;  %s494_s5 = smov 2  }
  0x4a   : > { %311 = dma.vmem_to_hbm [thread:$0]  (%p556_p9), %s205_s24, 128, %s207_s25, %s191_s9, %s493_s4, %s493_s4, %s494_s5  }
  0x4b PF: > { %s221_s12 = sand.u32 1, %s469_s6   ;;  %p318_p0 = pnand %p295_p12, %p563_p11 }
  0x4c   : > { %s222_s13 = scalar_lea.sflag [#allocation4], %s221_s12 }
  0x4d   : > { %p319_p1 = pneg %p318_p0 }
  0x4f   : > { %464 = dma.done.wait (%p319_p1), %s222_s13, 128  }
  0x50   : > { %466 = vsyncadd (%p319_p1), %s222_s13, 4294967168  ;;  %s17_s11 = sadd.s32 1, %s489_s11   ;;  %s635_s6 = smov %s473_s7 }
  0x51   : > { %p14_p2 = scmp.ge.s32.totalorder %s17_s11, 4   ;;  %s636_s7 = smov %s477_s8 }
  0x52   : > { %s637_s8 = smov %s561_s20  ;;  %s638_s9 = smov %s485_s10 }
  0x53   : > { %s639_s10 = smov %s641_s14  ;;  %16 = sbr.rel (!%p14_p2) target bundleno = 6 (0x6), region = 69 }
  0x58   :  { %228 = vsyncpa [#allocation3], 1 }
  0x59   :  { %230 = vsyncpa [#allocation3 + $0x1], 1 }
  0x5a   :  { %231 = vsyncpa [#allocation4], 1 }
  0x5b   :  { %233 = vsyncpa [#allocation4 + $0x1], 1 }

</bundles_post_ra>
